<compile_context>
chip_gen: v7x
topology: tpu7x:2x2x1
jax: 0.10.0
libtpu: 0.0.40
codegen_flags: <defaults>
</compile_context>

<pallas_src>
import jax
import jax.numpy as jnp
from jax.experimental import pallas as pl
from jax.experimental.pallas import tpu as pltpu

_LANE = 128
_NEG_BIG = -1e30  # masks padded logit columns out of the softmax


def _round_up(n, m):
    return ((n + m - 1) // m) * m


def mlp_kernel(x_ref, w1_ref, b1_ref, w2_ref, b2_ref, w3_ref, b3_ref,
               logits_ref, probs_ref):
    """Fused 3-layer MLP + softmax for one batch tile.

    Matmuls run on the MXU in the compute dtype (bf16 on v6e/v7x for peak
    throughput) with f32 accumulation; bias-add, ReLU and softmax stay f32.
    Padded logit columns carry a -1e30 bias so exp() zeroes them and the
    softmax over the real columns is exact.
    """
    compute_dtype = w1_ref.dtype

    # h1 + ReLU
    h = jnp.dot(x_ref[...], w1_ref[...],
                preferred_element_type=jnp.float32) + b1_ref[...]
    h = jnp.maximum(h, 0.0)

    # h2 + ReLU
    h = jnp.dot(h.astype(compute_dtype), w2_ref[...],
                preferred_element_type=jnp.float32) + b2_ref[...]
    h = jnp.maximum(h, 0.0)

    # out (logits)
    z = jnp.dot(h.astype(compute_dtype), w3_ref[...],
                preferred_element_type=jnp.float32) + b3_ref[...]
    logits_ref[...] = z.astype(logits_ref.dtype)

    # softmax over dim=1 (last axis), numerically stable; padded cols -> exp==0
    z_max = jnp.max(z, axis=-1, keepdims=True)
    e = jnp.exp(z - z_max)
    denom = jnp.sum(e, axis=-1, keepdims=True)
    probs_ref[...] = (e * pl.reciprocal(denom, approx=True)).astype(probs_ref.dtype)


def _vmem_estimate(tm, in_p, hid_p, out_p, itemsize):
    x_tiles = 2 * tm * in_p * itemsize                 # double-buffered input tile
    out_tiles = 2 * 2 * tm * out_p * 4                 # two f32 outputs, double-buffered
    weights = 2 * ((in_p * hid_p + hid_p * hid_p + hid_p * out_p) * itemsize
                   + (2 * hid_p + out_p) * 4)          # resident weights + biases
    acts = 2 * tm * hid_p * 4                          # f32 activation headroom
    return x_tiles + out_tiles + weights + acts


def classifier_mlp_forward(x, params, *, compute_dtype=jnp.bfloat16,
                           block_batch=256):
    """x: [B, in_dim] float32. params: dict of w1,b1,w2,b2,w3,b3 (f32).

    compute_dtype: dtype of the MXU operands (bf16 default; f32 for exactness).
    Weights are stored [fan_in, fan_out] so the kernel does x @ W + b.
    """
    w1, b1 = params["w1"], params["b1"]
    w2, b2 = params["w2"], params["b2"]
    w3, b3 = params["w3"], params["b3"]

    B, in_dim = x.shape
    hidden_dim = w1.shape[1]
    out_dim = w3.shape[1]

    in_p = _round_up(in_dim, _LANE)
    hid_p = _round_up(hidden_dim, _LANE)
    out_p = _round_up(out_dim, _LANE)
    itemsize = jnp.dtype(compute_dtype).itemsize

    # Pick the largest batch tile that fits comfortably in VMEM.
    # Budget against ~48 MiB so it also fits v7x's 64 MiB per-TC VMEM.
    tm = max(32, min(block_batch, _round_up(B, 32)))
    budget = 48 * 1024 * 1024
    while tm > 32 and _vmem_estimate(tm, in_p, hid_p, out_p, itemsize) > budget:
        tm //= 2
    b_pad = _round_up(B, tm)
    vmem_limit = int(min(56 * 1024 * 1024,
                         max(32 * 1024 * 1024,
                             1.25 * _vmem_estimate(tm, in_p, hid_p, out_p, itemsize))))

    # Lane-pad everything to multiples of 128 (lane-dense matmuls + stores),
    # pad the batch to a whole number of tiles. Zero padding is exact for the
    # linear layers; padded logit columns are masked via a -1e30 bias.
    xp = jnp.pad(x, ((0, b_pad - B), (0, in_p - in_dim))).astype(compute_dtype)
    w1p = jnp.pad(w1, ((0, in_p - in_dim), (0, hid_p - hidden_dim))).astype(compute_dtype)
    w2p = jnp.pad(w2, ((0, hid_p - hidden_dim), (0, hid_p - hidden_dim))).astype(compute_dtype)
    w3p = jnp.pad(w3, ((0, hid_p - hidden_dim), (0, out_p - out_dim))).astype(compute_dtype)
    b1p = jnp.pad(b1, ((0, 0), (0, hid_p - hidden_dim))).astype(jnp.float32)
    b2p = jnp.pad(b2, ((0, 0), (0, hid_p - hidden_dim))).astype(jnp.float32)
    b3p = jnp.pad(b3, ((0, 0), (0, out_p - out_dim)),
                  constant_values=_NEG_BIG).astype(jnp.float32)

    grid = (b_pad // tm,)
    resident = lambda shape: pl.BlockSpec(shape, lambda i: (0, 0))

    logits_p, probs_p = pl.pallas_call(
        mlp_kernel,
        out_shape=(
            jax.ShapeDtypeStruct((b_pad, out_p), jnp.float32),
            jax.ShapeDtypeStruct((b_pad, out_p), jnp.float32),
        ),
        grid=grid,
        in_specs=[
            pl.BlockSpec((tm, in_p), lambda i: (i, 0)),   # x: tiled over batch
            resident((in_p, hid_p)), resident((1, hid_p)),  # w1, b1 (VMEM-resident)
            resident((hid_p, hid_p)), resident((1, hid_p)), # w2, b2
            resident((hid_p, out_p)), resident((1, out_p)), # w3, b3
        ],
        out_specs=(
            pl.BlockSpec((tm, out_p), lambda i: (i, 0)),
            pl.BlockSpec((tm, out_p), lambda i: (i, 0)),
        ),
        compiler_params=pltpu.CompilerParams(
            dimension_semantics=("parallel",),  # shards batch tiles across TCs (v7x)
            vmem_limit_bytes=vmem_limit,
        ),
    )(xp, w1p, b1p, w2p, b2p, w3p, b3p)

    # Strip batch + lane padding.
    return logits_p[:B, :out_dim], probs_p[:B, :out_dim]


def init_params(key, in_dim, hidden_dim, out_dim):
    """Deterministic init mimicking PyTorch nn.Linear default (U(-1/sqrt(fan_in), +))."""
    keys = jax.random.split(key, 6)

    def linear(kw, kb, fan_in, fan_out):
        bound = 1.0 / jnp.sqrt(jnp.float32(fan_in))
        # stored as [fan_in, fan_out] so kernel computes x @ W + b
        w = jax.random.uniform(kw, (fan_in, fan_out), jnp.float32, -bound, bound)
        b = jax.random.uniform(kb, (1, fan_out), jnp.float32, -bound, bound)
        return w, b

    w1, b1 = linear(keys[0], keys[1], in_dim, hidden_dim)
    w2, b2 = linear(keys[2], keys[3], hidden_dim, hidden_dim)
    w3, b3 = linear(keys[4], keys[5], hidden_dim, out_dim)
    return {"w1": w1, "b1": b1, "w2": w2, "b2": b2, "w3": w3, "b3": b3}


def reference_forward(x, params):
    """Pure-JAX reference matching the PyTorch forward exactly (f32)."""
    h = jax.nn.relu(x @ params["w1"] + params["b1"])
    h = jax.nn.relu(h @ params["w2"] + params["b2"])
    z = h @ params["w3"] + params["b3"]
    return z, jax.nn.softmax(z, axis=1)


if __name__ == "__main__":
    key = jax.random.PRNGKey(0)
    k_x, k_p = jax.random.split(key)

    batch, in_dim, hidden_dim, out_dim = 8, 16, 32, 4
    x = jax.random.normal(k_x, (batch, in_dim), dtype=jnp.float32)
    params = init_params(k_p, in_dim, hidden_dim, out_dim)

    ref_logits, ref_probs = reference_forward(x, params)

    # Exact-precision path (f32 MXU operands) -- tight correctness check.
    logits32, probs32 = classifier_mlp_forward(x, params, compute_dtype=jnp.float32)
    logits32 = jax.block_until_ready(logits32)
    probs32 = jax.block_until_ready(probs32)
    assert jnp.allclose(logits32, ref_logits, atol=1e-4, rtol=1e-4)
    assert jnp.allclose(probs32, ref_probs, atol=5e-3, rtol=5e-3)   # approx reciprocal
    assert jnp.allclose(jnp.sum(probs32, axis=1), 1.0, atol=5e-3)

    # Performance path (bf16 MXU operands, f32 accumulate -- v6e/v7x peak rate).
    logits16, probs16 = classifier_mlp_forward(x, params, compute_dtype=jnp.bfloat16)
    logits16 = jax.block_until_ready(logits16)
    probs16 = jax.block_until_ready(probs16)
    assert jnp.allclose(logits16, ref_logits, atol=5e-2, rtol=5e-2)
    assert jnp.allclose(probs16, ref_probs, atol=2e-2, rtol=2e-2)
    assert jnp.allclose(jnp.sum(probs16, axis=1), 1.0, atol=5e-3)

    print("KERNEL_OK")
</pallas_src>

<mosaic_0001>
module attributes {stable_mosaic.version = 11 : i64} {
  func.func @mlp_kernel(%arg0: i32, %arg1: memref<32x128xf32, #tpu.memory_space<vmem>>, %arg2: memref<128x128xf32, #tpu.memory_space<vmem>>, %arg3: memref<1x128xf32, #tpu.memory_space<vmem>>, %arg4: memref<128x128xf32, #tpu.memory_space<vmem>>, %arg5: memref<1x128xf32, #tpu.memory_space<vmem>>, %arg6: memref<128x128xf32, #tpu.memory_space<vmem>>, %arg7: memref<1x128xf32, #tpu.memory_space<vmem>>, %arg8: memref<32x128xf32, #tpu.memory_space<vmem>>, %arg9: memref<32x128xf32, #tpu.memory_space<vmem>>) attributes {dimension_semantics = [#tpu.dimension_semantics<parallel>], iteration_bounds = array<i64: 1>, scalar_prefetch = 0 : i64, scratch_operands = 0 : i64, tpu.core_type = #tpu.core_type<tc>, window_params = [{transform_indices = @transform_0, window_bounds = array<i64: 32, 128>}, {pipeline_mode = #tpu.pipeline_mode<synchronous>, transform_indices = @transform_1, window_bounds = array<i64: 128, 128>}, {pipeline_mode = #tpu.pipeline_mode<synchronous>, transform_indices = @transform_2, window_bounds = array<i64: 1, 128>}, {pipeline_mode = #tpu.pipeline_mode<synchronous>, transform_indices = @transform_3, window_bounds = array<i64: 128, 128>}, {pipeline_mode = #tpu.pipeline_mode<synchronous>, transform_indices = @transform_4, window_bounds = array<i64: 1, 128>}, {pipeline_mode = #tpu.pipeline_mode<synchronous>, transform_indices = @transform_5, window_bounds = array<i64: 128, 128>}, {pipeline_mode = #tpu.pipeline_mode<synchronous>, transform_indices = @transform_6, window_bounds = array<i64: 1, 128>}, {transform_indices = @transform_7, window_bounds = array<i64: 32, 128>}, {transform_indices = @transform_8, window_bounds = array<i64: 32, 128>}]} {
    %c0 = arith.constant 0 : index
    %c0_0 = arith.constant 0 : index
    %0 = vector.load %arg1[%c0, %c0_0] : memref<32x128xf32, #tpu.memory_space<vmem>>, vector<32x128xf32>
    %c0_1 = arith.constant 0 : index
    %c0_2 = arith.constant 0 : index
    %1 = vector.load %arg2[%c0_1, %c0_2] : memref<128x128xf32, #tpu.memory_space<vmem>>, vector<128x128xf32>
    %cst = arith.constant dense<0.000000e+00> : vector<32x128xf32>
    %2 = tpu.matmul %0, %1, %cst {dimension_numbers = #tpu.dot_dimension_numbers<[1], [0], [0], [1], [0, 0, 1, 1], [], []>} : vector<32x128xf32>, vector<128x128xf32>, vector<32x128xf32> -> vector<32x128xf32>
    %c0_3 = arith.constant 0 : index
    %c0_4 = arith.constant 0 : index
    %3 = vector.load %arg3[%c0_3, %c0_4] : memref<1x128xf32, #tpu.memory_space<vmem>>, vector<1x128xf32>
    %4 = vector.broadcast %3 : vector<1x128xf32> to vector<32x128xf32>
    %5 = arith.addf %2, %4 : vector<32x128xf32>
    %cst_5 = arith.constant 0.000000e+00 : f32
    %6 = vector.broadcast %cst_5 : f32 to vector<32x128xf32>
    %7 = arith.maximumf %5, %6 : vector<32x128xf32>
    %c0_6 = arith.constant 0 : index
    %c0_7 = arith.constant 0 : index
    %8 = vector.load %arg4[%c0_6, %c0_7] : memref<128x128xf32, #tpu.memory_space<vmem>>, vector<128x128xf32>
    %cst_8 = arith.constant dense<0.000000e+00> : vector<32x128xf32>
    %9 = tpu.matmul %7, %8, %cst_8 {dimension_numbers = #tpu.dot_dimension_numbers<[1], [0], [0], [1], [0, 0, 1, 1], [], []>} : vector<32x128xf32>, vector<128x128xf32>, vector<32x128xf32> -> vector<32x128xf32>
    %c0_9 = arith.constant 0 : index
    %c0_10 = arith.constant 0 : index
    %10 = vector.load %arg5[%c0_9, %c0_10] : memref<1x128xf32, #tpu.memory_space<vmem>>, vector<1x128xf32>
    %11 = vector.broadcast %10 : vector<1x128xf32> to vector<32x128xf32>
    %12 = arith.addf %9, %11 : vector<32x128xf32>
    %cst_11 = arith.constant 0.000000e+00 : f32
    %13 = vector.broadcast %cst_11 : f32 to vector<32x128xf32>
    %14 = arith.maximumf %12, %13 : vector<32x128xf32>
    %c0_12 = arith.constant 0 : index
    %c0_13 = arith.constant 0 : index
    %15 = vector.load %arg6[%c0_12, %c0_13] : memref<128x128xf32, #tpu.memory_space<vmem>>, vector<128x128xf32>
    %cst_14 = arith.constant dense<0.000000e+00> : vector<32x128xf32>
    %16 = tpu.matmul %14, %15, %cst_14 {dimension_numbers = #tpu.dot_dimension_numbers<[1], [0], [0], [1], [0, 0, 1, 1], [], []>} : vector<32x128xf32>, vector<128x128xf32>, vector<32x128xf32> -> vector<32x128xf32>
    %c0_15 = arith.constant 0 : index
    %c0_16 = arith.constant 0 : index
    %17 = vector.load %arg7[%c0_15, %c0_16] : memref<1x128xf32, #tpu.memory_space<vmem>>, vector<1x128xf32>
    %18 = vector.broadcast %17 : vector<1x128xf32> to vector<32x128xf32>
    %19 = arith.addf %16, %18 : vector<32x128xf32>
    %c0_17 = arith.constant 0 : index
    %c0_18 = arith.constant 0 : index
    %20 = vector.load %arg8[%c0_17, %c0_18] : memref<32x128xf32, #tpu.memory_space<vmem>>, vector<32x128xf32>
    tpu.vector_store %arg8[%c0_17, %c0_18], %19 {strides = array<i32>} : memref<32x128xf32, #tpu.memory_space<vmem>>, vector<32x128xf32>,
    %cst_19 = arith.constant dense<0xFF800000> : vector<32xf32>
    %21 = vector.multi_reduction <maximumf>, %19, %cst_19 [1] : vector<32x128xf32> to vector<32xf32>
    %22 = vector.shape_cast %21 : vector<32xf32> to vector<32x1xf32>
    %23 = vector.broadcast %22 : vector<32x1xf32> to vector<32x128xf32>
    %24 = arith.subf %19, %23 : vector<32x128xf32>
    %25 = math.exp %24 : vector<32x128xf32>
    %cst_20 = arith.constant dense<0.000000e+00> : vector<32xf32>
    %26 = vector.multi_reduction <add>, %25, %cst_20 [1] : vector<32x128xf32> to vector<32xf32>
    %27 = vector.shape_cast %26 : vector<32xf32> to vector<32x1xf32>
    %28 = tpu.reciprocal %27 {approx = true} : vector<32x1xf32> -> vector<32x1xf32>
    %29 = vector.broadcast %28 : vector<32x1xf32> to vector<32x128xf32>
    %30 = arith.mulf %25, %29 : vector<32x128xf32>
    %c0_21 = arith.constant 0 : index
    %c0_22 = arith.constant 0 : index
    %31 = vector.load %arg9[%c0_21, %c0_22] : memref<32x128xf32, #tpu.memory_space<vmem>>, vector<32x128xf32>
    tpu.vector_store %arg9[%c0_21, %c0_22], %30 {strides = array<i32>} : memref<32x128xf32, #tpu.memory_space<vmem>>, vector<32x128xf32>,
    return
  }
  func.func @transform_0(%arg0: i32) -> (i32, i32) {
    %c0_i32 = arith.constant 0 : i32
    %c0_i32_0 = arith.constant 0 : i32
    return %arg0, %c0_i32 : i32, i32
  }
  func.func @transform_1(%arg0: i32) -> (i32, i32) {
    %c0_i32 = arith.constant 0 : i32
    %c0_i32_0 = arith.constant 0 : i32
    %c0_i32_1 = arith.constant 0 : i32
    return %c0_i32, %c0_i32_0 : i32, i32
  }
  func.func @transform_2(%arg0: i32) -> (i32, i32) {
    %c0_i32 = arith.constant 0 : i32
    %c0_i32_0 = arith.constant 0 : i32
    %c0_i32_1 = arith.constant 0 : i32
    return %c0_i32, %c0_i32_0 : i32, i32
  }
  func.func @transform_3(%arg0: i32) -> (i32, i32) {
    %c0_i32 = arith.constant 0 : i32
    %c0_i32_0 = arith.constant 0 : i32
    %c0_i32_1 = arith.constant 0 : i32
    return %c0_i32, %c0_i32_0 : i32, i32
  }
  func.func @transform_4(%arg0: i32) -> (i32, i32) {
    %c0_i32 = arith.constant 0 : i32
    %c0_i32_0 = arith.constant 0 : i32
    %c0_i32_1 = arith.constant 0 : i32
    return %c0_i32, %c0_i32_0 : i32, i32
  }
  func.func @transform_5(%arg0: i32) -> (i32, i32) {
    %c0_i32 = arith.constant 0 : i32
    %c0_i32_0 = arith.constant 0 : i32
    %c0_i32_1 = arith.constant 0 : i32
    return %c0_i32, %c0_i32_0 : i32, i32
  }
  func.func @transform_6(%arg0: i32) -> (i32, i32) {
    %c0_i32 = arith.constant 0 : i32
    %c0_i32_0 = arith.constant 0 : i32
    %c0_i32_1 = arith.constant 0 : i32
    return %c0_i32, %c0_i32_0 : i32, i32
  }
  func.func @transform_7(%arg0: i32) -> (i32, i32) {
    %c0_i32 = arith.constant 0 : i32
    %c0_i32_0 = arith.constant 0 : i32
    return %arg0, %c0_i32 : i32, i32
  }
  func.func @transform_8(%arg0: i32) -> (i32, i32) {
    %c0_i32 = arith.constant 0 : i32
    %c0_i32_0 = arith.constant 0 : i32
    return %arg0, %c0_i32 : i32, i32
  }
}

</mosaic_0001>

<bundles_post_ra>
// kernel: tpu_custom_call.1
= control target key start
LH: loop header
LB: loop body
LE: loop exit
PB: predicated region body
PF: predicated region fallthrough
CT: control target
= control target key end

     0   :  { %14 = vsyncpa [#allocation3], 0  ;;  %s1121_s0 = inlined_call_operand.hbm [shape: f32[32,128], index: 0, kind: input, shape index: {}]   ;;  %s1122_s1 = inlined_call_operand.hbm [shape: f32[128,128], index: 1, kind: input, shape index: {}]   ;;  %s1123_s2 = inlined_call_operand.vmem [shape: f32[1,128], index: 2, kind: input, shape index: {}]   ;;  %s1124_s3 = inlined_call_operand.hbm [shape: f32[128,128], index: 3, kind: input, shape index: {}]   ;;  %s1125_s4 = inlined_call_operand.vmem [shape: f32[1,128], index: 4, kind: input, shape index: {}]   ;;  %s1126_s5 = inlined_call_operand.hbm [shape: f32[128,128], index: 5, kind: input, shape index: {}]   ;;  %s1127_s6 = inlined_call_operand.vmem [shape: f32[1,128], index: 6, kind: input, shape index: {}]   ;;  %s1128_s7 = inlined_call_operand.hbm [shape: f32[32,128], index: 7, kind: output, shape index: {0}]   ;;  %s1129_s8 = inlined_call_operand.hbm [shape: f32[32,128], index: 8, kind: output, shape index: {1}]  }
   0x1   :  { %15 = vsyncpa [#allocation6], 0 }
   0x2   :  { %16 = vsyncpa [#allocation9], 0 }
   0x3   :  { %17 = vsyncpa [#allocation4], 0 }
   0x4   :  { %18 = vsyncpa [#allocation12], 0  ;;  %s955_s27 = smov [#allocation5]   ;;  %s956_s29 = smov [#allocation2]  }
   0x5   :  { %s36_s28 = sshll.u32 %s955_s27, 4  ;;  %s24_s30 = sshll.u32 %s956_s29, 4  ;;  %s37_s28 = int_to_ptr.vmem [resolvable:$true] %s36_s28  ;;  %s1008_s30 = int_to_ptr.vmem [resolvable:$true] %s24_s30 }
   0x6   :  { %s813_s11 = scalar_lea.hbm %s1122_s1, 2048 }
   0x7   :  { %p814_p0 = scmp.ne.s32.totalorder %s1122_s1, %s813_s11  ;;  %p817_p1 = scmp.lt.u32.totalorder %s813_s11, %s1122_s1 }
   0x9   :  { %p819_p2 = pnand %p817_p1, %p814_p0 }
   0xb   :  { %822 = shalt.err (!%p819_p2)
}
   0xc   :  { %s823_s16 = scalar_lea.vmem %s37_s28, 2048  ;;  %p828_p4 = scmp.lt.s32.totalorder %s37_s28, %s37_s28 }
   0xd   :  { %p824_p3 = scmp.ne.s32.totalorder %s37_s28, %s823_s16  ;;  %p829_p5 = scmp.lt.s32.totalorder %s823_s16, %s823_s16 }
   0xf   :  { %p830_p6 = por %p829_p5, %p828_p4 }
  0x11   :  { %p831_p7 = pnand %p830_p6, %p824_p3 }
  0x13   :  { %834 = shalt.err (!%p831_p7)
}
  0x14   :  { %s957_s17 = smov 128   ;;  %s958_s18 = smov 8  }
  0x15   :  { %42 = dma.hbm_to_vmem [thread:$0]  %s1122_s1, 2048, %s37_s28, [#allocation6], %s957_s17, %s957_s17, %s958_s18  }
  0x16   :  { %s835_s23 = scalar_lea.hbm %s1121_s0, 512 }
  0x17   :  { %p836_p8 = scmp.ne.s32.totalorder %s1121_s0, %s835_s23  ;;  %p839_p9 = scmp.lt.u32.totalorder %s835_s23, %s1121_s0 }
  0x19   :  { %p841_p10 = pnand %p839_p9, %p836_p8 }
  0x1b   :  { %844 = shalt.err (!%p841_p10)
}
  0x1c   :  { %s845_s29 = scalar_lea.vmem %s1008_s30, 512  ;;  %p850_p12 = scmp.lt.s32.totalorder %s1008_s30, %s1008_s30 }
  0x1d   :  { %p846_p11 = scmp.ne.s32.totalorder %s1008_s30, %s845_s29  ;;  %p851_p13 = scmp.lt.s32.totalorder %s845_s29, %s845_s29 }
  0x1f   :  { %p852_p0 = por %p851_p13, %p850_p12 }
  0x21   :  { %p853_p1 = pnand %p852_p0, %p846_p11 }
  0x23   :  { %856 = shalt.err (!%p853_p1)
}
  0x24   :  { %30 = dma.hbm_to_vmem [thread:$0]  %s1121_s0, 512, %s1008_s30, [#allocation3], %s957_s17, %s957_s17, %s958_s18  }
  0x25   :  { %s959_s9 = smov [#allocation7]   ;;  %s960_s11 = smov [#allocation8]  }
  0x26   :  { %s50_s10 = sshll.u32 %s959_s9, 4  ;;  %s64_s12 = sshll.u32 %s960_s11, 4  ;;  %s51_s10 = int_to_ptr.vmem [resolvable:$true] %s50_s10  ;;  %s1045_s12 = int_to_ptr.vmem [resolvable:$true] %s64_s12 }
  0x27   :  { %s857_s15 = scalar_lea.hbm %s1124_s3, 2048 }
  0x28   :  { %p858_p2 = scmp.ne.s32.totalorder %s1124_s3, %s857_s15  ;;  %p861_p3 = scmp.lt.u32.totalorder %s857_s15, %s1124_s3 }
  0x2a   :  { %p863_p4 = pnand %p861_p3, %p858_p2 }
  0x2c   :  { %866 = shalt.err (!%p863_p4)
}
  0x2d   :  { %s867_s0 = scalar_lea.vmem %s51_s10, 2048  ;;  %p872_p6 = scmp.lt.s32.totalorder %s51_s10, %s51_s10 }
  0x2e   :  { %p868_p5 = scmp.ne.s32.totalorder %s51_s10, %s867_s0  ;;  %p873_p7 = scmp.lt.s32.totalorder %s867_s0, %s867_s0 }
  0x30   :  { %p874_p8 = por %p873_p7, %p872_p6 }
  0x32   :  { %p875_p9 = pnand %p874_p8, %p868_p5 }
  0x34   :  { %878 = shalt.err (!%p875_p9)
}
  0x35   :  { %56 = dma.hbm_to_vmem [thread:$0]  %s1124_s3, 2048, %s51_s10, [#allocation6], %s957_s17, %s957_s17, %s958_s18  }
  0x36   :  { %s879_s25 = scalar_lea.hbm %s1126_s5, 2048 }
  0x37   :  { %p880_p10 = scmp.ne.s32.totalorder %s1126_s5, %s879_s25  ;;  %p883_p11 = scmp.lt.u32.totalorder %s879_s25, %s1126_s5 }
  0x39   :  { %p885_p12 = pnand %p883_p11, %p880_p10 }
  0x3b   :  { %888 = shalt.err (!%p885_p12)
}
  0x3c   :  { %s889_s28 = scalar_lea.vmem %s1045_s12, 2048  ;;  %p894_p0 = scmp.lt.s32.totalorder %s1045_s12, %s1045_s12 }
  0x3d   :  { %p890_p13 = scmp.ne.s32.totalorder %s1045_s12, %s889_s28  ;;  %p895_p1 = scmp.lt.s32.totalorder %s889_s28, %s889_s28 }
  0x3f   :  { %p896_p2 = por %p895_p1, %p894_p0 }
  0x41   :  { %p897_p3 = pnand %p896_p2, %p890_p13 }
  0x43   :  { %900 = shalt.err (!%p897_p3)
}
  0x44   :  { %70 = dma.hbm_to_vmem [thread:$0]  %s1126_s5, 2048, %s1045_s12, [#allocation9], %s957_s17, %s957_s17, %s958_s18  }
  0x45   :  { %945 = dma.done.wait [#allocation3], 512  }
  0x46   :  { %946 = vsyncadd [#allocation3], 4294966784 }
  0x47   :  { %947 = dma.done.wait [#allocation6], 4096  }
  0x48   :  { %948 = vsyncadd [#allocation6], 4294963200 }
  0x49   :  { %949 = dma.done.wait [#allocation9], 2048  }
  0x4a   :  { %950 = vsyncadd [#allocation9], 4294965248  ;;  %v89_v0 = vld [vmem:[#allocation5] sm:$0xff]  ;;  %v90_v1 = vld [vmem:[#allocation5 + $0x8] sm:$0xff] }
  0x4b   :  { %v91_v2 = vld [vmem:[#allocation5 + $0x10] sm:$0xff]  ;;  %v677_v3 = vpack.c.bf16 %v90_v1, %v89_v0  ;;  %v92_v4 = vld [vmem:[#allocation5 + $0x18] sm:$0xff]  ;;  %v93_v6 = vld [vmem:[#allocation5 + $0x20] sm:$0xff] }
  0x4c   :  { %v681_v5 = vpack.c.bf16 %v92_v4, %v91_v2  ;;  %v94_v7 = vld [vmem:[#allocation5 + $0x28] sm:$0xff]  ;;  %v85_v9 = vld [vmem:[#allocation2] sm:$0xff]  ;;  %v95_v10 = vld [vmem:[#allocation5 + $0x30] sm:$0xff] }
  0x4d   :  { %678 = vmatprep.subr.bf16.mxu0 %v677_v3  ;;  %v685_v8 = vpack.c.bf16 %v94_v7, %v93_v6  ;;  %v96_v11 = vld [vmem:[#allocation5 + $0x38] sm:$0xff]  ;;  %595 = vmatprep.mubr.f32.mxu0 %v85_v9  ;;  %v201_v12 = vld [vmem:[#allocation7] sm:$0xff]  ;;  %v202_v13 = vld [vmem:[#allocation7 + $0x8] sm:$0xff] }
  0x4e   :  { %680 = vmatpush3.bf16.msra.mxu0 %v677_v3  ;;  %v203_v14 = vld [vmem:[#allocation7 + $0x10] sm:$0xff]  ;;  %v204_v15 = vld [vmem:[#allocation7 + $0x18] sm:$0xff]  ;;  %v709_v16 = vpack.c.bf16 %v202_v13, %v201_v12  ;;  %v689_v18 = vpack.c.bf16 %v96_v11, %v95_v10  ;;  %v205_v19 = vld [vmem:[#allocation7 + $0x20] sm:$0xff] }
  0x4f   :  { %682 = vmatprep.subr.bf16.mxu0 %v681_v5  ;;  %v713_v17 = vpack.c.bf16 %v204_v15, %v203_v14  ;;  %v206_v20 = vld [vmem:[#allocation7 + $0x28] sm:$0xff]  ;;  %v97_v21 = vld [vmem:[#allocation5 + $0x40] sm:$0xff]  ;;  %v207_v25 = vld [vmem:[#allocation7 + $0x30] sm:$0xff] }
  0x50   :  { %v98_v22 = vld [vmem:[#allocation5 + $0x48] sm:$0xff]  ;;  %710 = vmatprep.subr.bf16.mxu1 %v709_v16  ;;  %v717_v23 = vpack.c.bf16 %v206_v20, %v205_v19  ;;  %v208_v26 = vld [vmem:[#allocation7 + $0x38] sm:$0xff]  ;;  %v99_v27 = vld [vmem:[#allocation5 + $0x50] sm:$0xff] }
  0x51   :  { %712 = vmatpush3.bf16.msra.mxu1 %v709_v16  ;;  %v693_v24 = vpack.c.bf16 %v98_v22, %v97_v21  ;;  %v100_v28 = vld [vmem:[#allocation5 + $0x58] sm:$0xff]  ;;  %v721_v29 = vpack.c.bf16 %v208_v26, %v207_v25  ;;  %v209_v31 = vld [vmem:[#allocation7 + $0x40] sm:$0xff]  ;;  %v210_v32 = vld [vmem:[#allocation7 + $0x48] sm:$0xff] }
  0x52   :  { %684 = vmatpush3.bf16.msra.mxu0 %v681_v5  ;;  %714 = vmatprep.subr.bf16.mxu1 %v713_v17  ;;  %v697_v30 = vpack.c.bf16 %v100_v28, %v99_v27  ;;  %v101_v33 = vld [vmem:[#allocation5 + $0x60] sm:$0xff]  ;;  %v102_v34 = vld [vmem:[#allocation5 + $0x68] sm:$0xff]  ;;  %v725_v35 = vpack.c.bf16 %v210_v32, %v209_v31  ;;  %v211_v37 = vld [vmem:[#allocation7 + $0x50] sm:$0xff] }
  0x53   :  { %686 = vmatprep.subr.bf16.mxu0 %v685_v8  ;;  %v701_v36 = vpack.c.bf16 %v102_v34, %v101_v33  ;;  %v212_v38 = vld [vmem:[#allocation7 + $0x58] sm:$0xff]  ;;  %v103_v39 = vld [vmem:[#allocation5 + $0x70] sm:$0xff]  ;;  %v213_v43 = vld [vmem:[#allocation7 + $0x60] sm:$0xff] }
  0x54   :  { %v104_v40 = vld [vmem:[#allocation5 + $0x78] sm:$0xff]  ;;  %v729_v41 = vpack.c.bf16 %v212_v38, %v211_v37  ;;  %v214_v44 = vld [vmem:[#allocation7 + $0x68] sm:$0xff]  ;;  %v87_v47 = vld [vmem:[#allocation2 + $0x10] sm:$0xff] }
  0x55   :  { %716 = vmatpush3.bf16.msra.mxu1 %v713_v17  ;;  %v705_v42 = vpack.c.bf16 %v104_v40, %v103_v39  ;;  %v733_v45 = vpack.c.bf16 %v214_v44, %v213_v43  ;;  %v86_v46 = vld [vmem:[#allocation2 + $0x8] sm:$0xff]  ;;  %v88_v48 = vld [vmem:[#allocation2 + $0x18] sm:$0xff]  ;;  %v215_v49 = vld [vmem:[#allocation7 + $0x70] sm:$0xff] }
  0x56   :  { %688 = vmatpush3.bf16.msra.mxu0 %v685_v8  ;;  %718 = vmatprep.subr.bf16.mxu1 %v717_v23  ;;  %v216_v50 = vld [vmem:[#allocation7 + $0x78] sm:$0xff]  ;;  %v313_v52 = vld [vmem:[#allocation8] sm:$0xff]  ;;  %v314_v53 = vld [vmem:[#allocation8 + $0x8] sm:$0xff] }
  0x57   :  { %690 = vmatprep.subr.bf16.mxu0 %v689_v18  ;;  %v737_v51 = vpack.c.bf16 %v216_v50, %v215_v49  ;;  %v315_v54 = vld [vmem:[#allocation8 + $0x10] sm:$0xff]  ;;  %v741_v55 = vpack.c.bf16 %v314_v53, %v313_v52  ;;  %v316_v56 = vld [vmem:[#allocation8 + $0x18] sm:$0xff]  ;;  %v317_v58 = vld [vmem:[#allocation8 + $0x20] sm:$0xff] }
  0x58   :  { %v745_v57 = vpack.c.bf16 %v316_v56, %v315_v54  ;;  %v318_v59 = vld [vmem:[#allocation8 + $0x28] sm:$0xff]  ;;  %v319_v61 = vld [vmem:[#allocation8 + $0x30] sm:$0xff]  ;;  %v320_v62 = vld [vmem:[#allocation8 + $0x38] sm:$0xff] }
  0x59   :  { %720 = vmatpush3.bf16.msra.mxu1 %v717_v23  ;;  %v749_v60 = vpack.c.bf16 %v318_v59, %v317_v58  ;;  %v753_v63 = vpack.c.bf16 %v320_v62, %v319_v61  ;;  %v321_v0 = vld [vmem:[#allocation8 + $0x40] sm:$0xff]  ;;  %v322_v1 = vld [vmem:[#allocation8 + $0x48] sm:$0xff]  ;;  %v323_v3 = vld [vmem:[#allocation8 + $0x50] sm:$0xff] }
  0x5a   :  { %692 = vmatpush3.bf16.msra.mxu0 %v689_v18  ;;  %722 = vmatprep.subr.bf16.mxu1 %v721_v29  ;;  %v757_v2 = vpack.c.bf16 %v322_v1, %v321_v0  ;;  %v324_v4 = vld [vmem:[#allocation8 + $0x58] sm:$0xff]  ;;  %v325_v6 = vld [vmem:[#allocation8 + $0x60] sm:$0xff]  ;;  %v326_v7 = vld [vmem:[#allocation8 + $0x68] sm:$0xff] }
  0x5b   :  { %694 = vmatprep.subr.bf16.mxu0 %v693_v24  ;;  %v761_v5 = vpack.c.bf16 %v324_v4, %v323_v3  ;;  %v765_v8 = vpack.c.bf16 %v326_v7, %v325_v6  ;;  %v500_v9 = vld [vmem:[%s1123_s2] ss:$0 sm:$0xff]  ;;  %v327_v22 = vld [vmem:[#allocation8 + $0x70] sm:$0xff]  ;;  %v328_v23 = vld [vmem:[#allocation8 + $0x78] sm:$0xff] }
  0x5c   :  { %v501_v25 = vld [vmem:[%s1125_s4] ss:$0 sm:$0xff]  ;;  %s961_s4 = smov [#allocation10]  }
  0x5d   :  { %724 = vmatpush3.bf16.msra.mxu1 %v721_v29  ;;  %v502_v38 = vld [vmem:[%s1127_s6] ss:$0 sm:$0xff]  ;;  %s470_s6 = sshll.u32 %s961_s4, 4  ;;  %s471_s6 = int_to_ptr.vmem [resolvable:$true] %s470_s6 }
  0x5e   :  { %696 = vmatpush3.bf16.msra.mxu0 %v693_v24  ;;  %726 = vmatprep.subr.bf16.mxu1 %v725_v35  ;;  %v769_v24 = vpack.c.bf16 %v328_v23, %v327_v22  ;;  %s901_s14 = scalar_lea.vmem %s471_s6, 512  ;;  %p906_p5 = scmp.lt.s32.totalorder %s471_s6, %s471_s6 }
  0x5f   :  { %698 = vmatprep.subr.bf16.mxu0 %v697_v30  ;;  %p902_p4 = scmp.ne.s32.totalorder %s471_s6, %s901_s14  ;;  %p907_p6 = scmp.lt.s32.totalorder %s901_s14, %s901_s14 }
  0x61   :  { %728 = vmatpush3.bf16.msra.mxu1 %v725_v35  ;;  %p908_p7 = por %p907_p6, %p906_p5 }
  0x62   :  { %700 = vmatpush3.bf16.msra.mxu0 %v697_v30  ;;  %730 = vmatprep.subr.bf16.mxu1 %v729_v41 }
  0x63   :  { %702 = vmatprep.subr.bf16.mxu0 %v701_v36  ;;  %p909_p8 = pnand %p908_p7, %p902_p4 }
  0x65   :  { %732 = vmatpush3.bf16.msra.mxu1 %v729_v41 }
  0x66   :  { %704 = vmatpush3.bf16.msra.mxu0 %v701_v36  ;;  %734 = vmatprep.subr.bf16.mxu1 %v733_v45 }
  0x67   :  { %706 = vmatprep.subr.bf16.mxu0 %v705_v42 }
  0x69   :  { %736 = vmatpush3.bf16.msra.mxu1 %v733_v45 }
  0x6a   :  { %708 = vmatpush3.bf16.msra.mxu0 %v705_v42  ;;  %738 = vmatprep.subr.bf16.mxu1 %v737_v51 }
  0x6b   :  { %742 = vmatprep.subr.bf16.mxu0 %v741_v55 }
  0x6d   :  { %596 = vmatmul.mubr.f32.vlgmr.msra.gmra.mrb[0].mxu0 %v86_v46  ;;  %740 = vmatpush3.bf16.msra.mxu1 %v737_v51 }
  0x6e   :  { %598 = vmatprep.mubr.f32.mxu0 %v87_v47  ;;  %773 = vmatprep.subr.bf16.mxu1 %v741_v55 }
  0x6f   :  { %744 = vmatpush3.bf16.msra.mxu0 %v741_v55 }
  0x70   :  { %746 = vmatprep.subr.bf16.mxu0 %v745_v57 }
  0x71   :  { %599 = vmatmul.mubr.f32.gmra.mrb[2].mxu0 %v88_v48 }
  0x73   :  { %748 = vmatpush3.bf16.msra.mxu0 %v745_v57 }
  0x74   :  { %750 = vmatprep.subr.bf16.mxu0 %v749_v60 }
  0x77   :  { %752 = vmatpush3.bf16.msra.mxu0 %v749_v60 }
  0x78   :  { %754 = vmatprep.subr.bf16.mxu0 %v753_v63 }
  0x7b   :  { %756 = vmatpush3.bf16.msra.mxu0 %v753_v63 }
  0x7c   :  { %758 = vmatprep.subr.bf16.mxu0 %v757_v2 }
  0x7f   :  { %760 = vmatpush3.bf16.msra.mxu0 %v757_v2 }
  0x80   :  { %762 = vmatprep.subr.bf16.mxu0 %v761_v5 }
  0x83   :  { %764 = vmatpush3.bf16.msra.mxu0 %v761_v5 }
  0x84   :  { %766 = vmatprep.subr.bf16.mxu0 %v765_v8 }
  0x87   :  { %768 = vmatpush3.bf16.msra.mxu0 %v765_v8 }
  0x88   :  { %770 = vmatprep.subr.bf16.mxu0 %v769_v24 }
  0x8b   :  { %772 = vmatpush3.bf16.msra.mxu0 %v769_v24 }
 0x140   :  { %v597_v10 = vpop.f32.mrb[0].mxu0 }
 0x141   :  { %v184_v11 = vadd.f32 %v597_v10, %v500_v9  ;;  %v178_v12 = vpop.f32.mrb[1].mxu0 }
 0x142   :  { %v179_v13 = vadd.f32 %v500_v9, %v178_v12 }
 0x143   :  { %v198_v16 = vmax.f32 %v184_v11, 0.0 }
 0x144   :  { %v600_v14 = vpop.f32.mrb[2].mxu0  ;;  %v197_v15 = vmax.f32 %v179_v13, 0.0 }
 0x145   :  { %v194_v17 = vadd.f32 %v600_v14, %v500_v9  ;;  %v188_v18 = vpop.f32.mrb[3].mxu0 }
 0x146   :  { %v189_v19 = vadd.f32 %v500_v9, %v188_v18  ;;  %633 = vmatprep.mubr.f32.mxu1 %v197_v15 }
 0x147   :  { %634 = vmatmul.mubr.f32.vlgmr.msra.gmra.mrb[0].mxu1 %v198_v16  ;;  %v200_v21 = vmax.f32 %v194_v17, 0.0 }
 0x148   :  { %v199_v20 = vmax.f32 %v189_v19, 0.0  ;;  %781 = vmatpush3.bf16.msra.mxu1 %v741_v55 }
 0x149   :  { %774 = vmatprep.subr.bf16.mxu1 %v745_v57 }
 0x14a   :  { %636 = vmatprep.mubr.f32.mxu1 %v199_v20 }
 0x14b   :  { %637 = vmatmul.mubr.f32.gmra.mrb[2].mxu1 %v200_v21 }
 0x14c   :  { %782 = vmatpush3.bf16.msra.mxu1 %v745_v57 }
 0x14d   :  { %775 = vmatprep.subr.bf16.mxu1 %v749_v60 }
 0x150   :  { %783 = vmatpush3.bf16.msra.mxu1 %v749_v60 }
 0x151   :  { %776 = vmatprep.subr.bf16.mxu1 %v753_v63 }
 0x154   :  { %784 = vmatpush3.bf16.msra.mxu1 %v753_v63 }
 0x155   :  { %777 = vmatprep.subr.bf16.mxu1 %v757_v2 }
 0x158   :  { %785 = vmatpush3.bf16.msra.mxu1 %v757_v2 }
 0x159   :  { %778 = vmatprep.subr.bf16.mxu1 %v761_v5 }
 0x15c   :  { %786 = vmatpush3.bf16.msra.mxu1 %v761_v5 }
 0x15d   :  { %779 = vmatprep.subr.bf16.mxu1 %v765_v8 }
 0x160   :  { %787 = vmatpush3.bf16.msra.mxu1 %v765_v8 }
 0x161   :  { %780 = vmatprep.subr.bf16.mxu1 %v769_v24 }
 0x164   :  { %788 = vmatpush3.bf16.msra.mxu1 %v769_v24 }
 0x21a   :  { %v635_v26 = vpop.f32.mrb[0].mxu1 }
 0x21b   :  { %v296_v27 = vadd.f32 %v635_v26, %v501_v25  ;;  %v290_v28 = vpop.f32.mrb[1].mxu1 }
 0x21c   :  { %v291_v29 = vadd.f32 %v501_v25, %v290_v28 }
 0x21d   :  { %v310_v32 = vmax.f32 %v296_v27, 0.0 }
 0x21e   :  { %v309_v30 = vmax.f32 %v291_v29, 0.0  ;;  %v638_v31 = vpop.f32.mrb[2].mxu1 }
 0x21f   :  { %v306_v33 = vadd.f32 %v638_v31, %v501_v25  ;;  %v300_v34 = vpop.f32.mrb[3].mxu1 }
 0x220   :  { %v301_v35 = vadd.f32 %v501_v25, %v300_v34  ;;  %671 = vmatprep.mubr.f32.mxu0 %v309_v30 }
 0x221   :  { %672 = vmatmul.mubr.f32.vlgmr.msra.gmra.mrb[4].mxu0 %v310_v32  ;;  %v312_v37 = vmax.f32 %v306_v33, 0.0 }
 0x222   :  { %v311_v36 = vmax.f32 %v301_v35, 0.0 }
 0x224   :  { %674 = vmatprep.mubr.f32.mxu1 %v311_v36 }
 0x225   :  { %675 = vmatmul.mubr.f32.vlgmr.msra.gmra.mrb[4].mxu1 %v312_v37 }
 0x2f4   :  { %v673_v39 = vpop.f32.mrb[4].mxu0 }
 0x2f5   :  { %v408_v40 = vadd.f32 %v673_v39, %v502_v38  ;;  %v402_v41 = vpop.f32.mrb[5].mxu0 }
 0x2f6   :  { %v403_v42 = vadd.f32 %v502_v38, %v402_v41 }
 0x2f7   :  { %422 = vst [vmem:[#allocation10 + $0x8] sm:$0xff] %v408_v40 }
 0x2f8   :  { %421 = vst [vmem:[#allocation10] sm:$0xff] %v403_v42  ;;  %v676_v43 = vpop.f32.mrb[4].mxu1  ;;  %425 = vmax.xlane.f32.xlu0 %v403_v42 }
 0x2f9   :  { %v418_v44 = vadd.f32 %v676_v43, %v502_v38  ;;  %v412_v45 = vpop.f32.mrb[5].mxu1 }
 0x2fa   :  { %v413_v46 = vadd.f32 %v502_v38, %v412_v45 }
 0x2fb   :  { %424 = vst [vmem:[#allocation10 + $0x18] sm:$0xff] %v418_v44 }
 0x2fc   :  { %423 = vst [vmem:[#allocation10 + $0x10] sm:$0xff] %v413_v46  ;;  %429 = vmax.xlane.f32.xlu1 %v413_v46  ;;  %427 = vmax.xlane.f32.xlu0 %v408_v40 }
 0x300   :  { %431 = vmax.xlane.f32.xlu1 %v418_v44 }
 0x385   :  { %v426_v47 = vpop.xlane.xlu0 %425 }
 0x386   :  { %v433_v48 = vsub.f32 %v403_v42, %v426_v47 }
 0x388   :  { %v437_v49 = vmul.f32 1.442695, %v433_v48 }
 0x389   :  { %v430_v50 = vpop.xlane.xlu1 %429  ;;  %v428_v51 = vpop.xlane.xlu0 %427 }
 0x38a   :  { %797 = vpow2.f32 %v437_v49  ;;  %v435_v52 = vsub.f32 %v413_v46, %v430_v50  ;;  %v434_v53 = vsub.f32 %v408_v40, %v428_v51 }
 0x38c   :  { %v441_v54 = vmul.f32 1.442695, %v435_v52  ;;  %v439_v55 = vmul.f32 1.442695, %v434_v53 }
 0x38d   :  { %v432_v56 = vpop.xlane.xlu1 %431 }
 0x38e   :  { %799 = vpow2.f32 %v441_v54  ;;  %v436_v57 = vsub.f32 %v418_v44, %v432_v56 }
 0x38f   :  { %801 = vpow2.f32 %v439_v55 }
 0x390   :  { %v443_v58 = vmul.f32 1.442695, %v436_v57 }
 0x392   :  { %803 = vpow2.f32 %v443_v58 }
 0x394   :  { %v798_v59 = vpop.eup %797 }
 0x395   :  { %445 = vadd.xlane.f32.xlu0 %v798_v59 }
 0x398   :  { %v800_v60 = vpop.eup %799 }
 0x399   :  { %v802_v61 = vpop.eup %801  ;;  %449 = vadd.xlane.f32.xlu0 %v800_v60 }
 0x39a   :  { %447 = vadd.xlane.f32.xlu1 %v802_v61 }
 0x39c   :  { %v804_v62 = vpop.eup %803 }
 0x39e   :  { %451 = vadd.xlane.f32.xlu1 %v804_v62 }
 0x39f   :  { %912 = shalt.err (!%p909_p8)
}
 0x3a0   :  { %s913_s19 = scalar_lea.hbm %s1128_s7, 512 }
 0x3a1   :  { %p914_p9 = scmp.ne.s32.totalorder %s1128_s7, %s913_s19  ;;  %p917_p10 = scmp.lt.u32.totalorder %s913_s19, %s1128_s7 }
 0x3a3   :  { %p919_p11 = pnand %p917_p10, %p914_p9 }
 0x3a5   :  { %922 = shalt.err (!%p919_p11)
}
 0x3a6   :  { %476 = dma.vmem_to_hbm [thread:$0]  %s471_s6, 512, %s1128_s7, [#allocation4], %s957_s17, %s957_s17, %s958_s18  }
 0x3a7   :  { %s962_s24 = smov [#allocation11]  }
 0x3a8   :  { %s482_s25 = sshll.u32 %s962_s24, 4  ;;  %s483_s25 = int_to_ptr.vmem [resolvable:$true] %s482_s25 }
 0x3a9   :  { %s923_s7 = scalar_lea.vmem %s483_s25, 512  ;;  %p928_p13 = scmp.lt.s32.totalorder %s483_s25, %s483_s25 }
 0x3aa   :  { %p924_p12 = scmp.ne.s32.totalorder %s483_s25, %s923_s7  ;;  %p929_p0 = scmp.lt.s32.totalorder %s923_s7, %s923_s7 }
 0x3ac   :  { %p930_p1 = por %p929_p0, %p928_p13 }
 0x3ae   :  { %p931_p2 = pnand %p930_p1, %p924_p12 }
 0x422   :  { %v446_v63 = vpop.xlane.xlu0 %445 }
 0x423   :  { %805 = vrcp.f32 %v446_v63 }
 0x426   :  { %v450_v0 = vpop.xlane.xlu0 %449 }
 0x427   :  { %v448_v1 = vpop.xlane.xlu1 %447  ;;  %807 = vrcp.f32 %v450_v0 }
 0x428   :  { %809 = vrcp.f32 %v448_v1 }
 0x42b   :  { %v452_v2 = vpop.xlane.xlu1 %451 }
 0x42c   :  { %811 = vrcp.f32 %v452_v2 }
 0x42d   :  { %v806_v3 = vpop.eup %805 }
 0x42e   :  { %v457_v4 = vmul.f32 %v806_v3, %v798_v59 }
 0x430   :  { %461 = vst [vmem:[#allocation11] sm:$0xff] %v457_v4 }
 0x431   :  { %v808_v5 = vpop.eup %807 }
 0x432   :  { %v810_v6 = vpop.eup %809  ;;  %v459_v7 = vmul.f32 %v808_v5, %v800_v60 }
 0x433   :  { %v458_v8 = vmul.f32 %v810_v6, %v802_v61 }
 0x434   :  { %463 = vst [vmem:[#allocation11 + $0x10] sm:$0xff] %v459_v7 }
 0x435   :  { %462 = vst [vmem:[#allocation11 + $0x8] sm:$0xff] %v458_v8 }
 0x436   :  { %v812_v9 = vpop.eup %811 }
 0x437   :  { %v460_v10 = vmul.f32 %v812_v9, %v804_v62 }
 0x439   :  { %464 = vst [vmem:[#allocation11 + $0x18] sm:$0xff] %v460_v10 }
 0x43a   :  { %934 = shalt.err (!%p931_p2)
}
 0x43b   :  { %s935_s29 = scalar_lea.hbm %s1129_s8, 512 }
 0x43c   :  { %p936_p3 = scmp.ne.s32.totalorder %s1129_s8, %s935_s29  ;;  %p939_p4 = scmp.lt.u32.totalorder %s935_s29, %s1129_s8 }
 0x43e   :  { %p941_p5 = pnand %p939_p4, %p936_p3 }
 0x440   :  { %944 = shalt.err (!%p941_p5)
}
 0x441   :  { %488 = dma.vmem_to_hbm [thread:$0]  %s483_s25, 512, %s1129_s8, [#allocation12], %s957_s17, %s957_s17, %s958_s18  }
 0x442   :  { %951 = dma.done.wait [#allocation4], 512  }
 0x443   :  { %952 = vsyncadd [#allocation4], 4294966784 }
 0x444   :  { %953 = dma.done.wait [#allocation12], 512  }
 0x445   :  { %954 = vsyncadd [#allocation12], 4294966784 }
 0x446   :  { %495 = vsyncpa [#allocation3], 1 }
 0x447   :  { %496 = vsyncpa [#allocation6], 1 }
 0x448   :  { %497 = vsyncpa [#allocation9], 1 }
 0x449   :  { %498 = vsyncpa [#allocation4], 1 }
 0x44a   :  { %499 = vsyncpa [#allocation12], 1 }

</bundles_post_ra>
